<compile_context>
chip_gen: v5e
topology: v5e:2x2
jax: 0.10.0
libtpu: 0.0.40
codegen_flags: <defaults>
</compile_context>

<pallas_src>
import jax
import jax.numpy as jnp
from jax import lax
from jax.experimental import pallas as pl
from jax.experimental.pallas import tpu as pltpu


def _mlp_kernel(x_ref, w1_ref, b1_ref, w2_ref, b2_ref, o_ref):
    # hidden = relu(x @ W1 + b1) -- first layer on the MXU, f32 accumulate.
    h = jnp.dot(x_ref[...], w1_ref[...], preferred_element_type=jnp.float32)
    h = jnp.maximum(h + b1_ref[...], 0.0)                       # [TB, H] f32

    # Second layer (out_features == 1): contract H on the (otherwise idle) MXU
    # and emit the lane-dense [1, TB] row directly -- no reduce, no transpose.
    z = lax.dot_general(w2_ref[...], h,
                        dimension_numbers=(((1,), (1,)), ((), ())),
                        preferred_element_type=jnp.float32)     # [1, TB]
    z = z + b2_ref[0]                                           # scalar bias from SMEM

    # Exact f32 sigmoid: exp on the EUP + exact divide.  (The approximate
    # reciprocal previously broke the 1e-3 tolerance; EUP is not a bottleneck.)
    o_ref[...] = (1.0 / (1.0 + jnp.exp(-z))).astype(o_ref.dtype)


def _pick_batch_tile(B, D, itemsize):
    """Rows per grid step: ~2 MiB streamed x tile (hides per-step overhead),
    multiple of 128 (legal sublane/lane block shape), and at least two blocks
    on big batches so both v7x TensorCores get work."""
    if B <= 256:
        return B                                    # single full-extent block
    target = max(128, ((2 << 20) // (D * itemsize)) // 128 * 128)
    half = max(128, (B // 2) // 128 * 128)          # keep >= 2 blocks (megacore)
    return min(target, half)


def neural_net_forward(x, w1, b1, w2, b2, *, block_b=None, compute_dtype=None):
    """x: [B, in]; w1: [in, hidden]; b1: [1, hidden] (or [hidden]);
    w2: [hidden, 1]; b2: [1, 1].  Returns [B, 1] float32 sigmoid probabilities."""
    B, D = x.shape
    H = w1.shape[1]

    # The kernel is HBM-bound on streaming x.  For large inputs, bf16 halves
    # that traffic (MXU takes bf16 on v5e/v6e/v7x; accumulate + epilogue stay
    # f32).  For small inputs the wrapper-side cast isn't worth the extra copy.
    if compute_dtype is None:
        compute_dtype = (jnp.bfloat16
                         if x.size * x.dtype.itemsize >= (64 << 20)
                         else x.dtype)
    x_c = x.astype(compute_dtype)
    w1_c = jnp.asarray(w1).astype(compute_dtype)

    b1_row = jnp.asarray(b1, jnp.float32).reshape(1, H)
    w2_row = jnp.asarray(w2, jnp.float32).reshape(1, H)    # pre-transposed row
    b2_s = jnp.asarray(b2, jnp.float32).reshape(1)         # scalar -> SMEM

    itemsize = jnp.dtype(compute_dtype).itemsize

    # D-aware batch tile; no padding of x -- Pallas handles the ragged last
    # block (OOB input rows are garbage that only feeds masked output writes).
    if block_b is None:
        TB = _pick_batch_tile(B, D, itemsize)
    else:
        TB = B if block_b >= B else max(128, (block_b // 128) * 128)
    n_blocks = pl.cdiv(B, TB)

    # Explicit VMEM budget: double-buffered x tile + output row, resident
    # weights (counted conservatively at 2 buffers), plus headroom.  Capped at
    # 64 MiB so the same number is legal on v7x; floor at the v5e default.
    need = (2 * TB * D * itemsize          # streamed x tiles
            + 2 * TB * 4                   # streamed output row
            + 2 * D * H * itemsize         # resident W1
            + 4 * H * 4)                   # b1 + w2 rows
    vmem_limit = int(max(16 << 20, min(2 * need + (2 << 20), 64 << 20)))
    # NOTE: if D*H ever gets big enough that resident W1 threatens v7x's
    # 64 MiB, single-buffer the weight specs or add a K-tiling grid axis.

    cost = pl.CostEstimate(
        flops=2 * B * D * H + 2 * B * H + 5 * B,
        transcendentals=B,
        bytes_accessed=B * D * itemsize + D * H * itemsize + 4 * (2 * H + 1 + B),
    )

    out_row = pl.pallas_call(
        _mlp_kernel,
        out_shape=jax.ShapeDtypeStruct((1, B), jnp.float32),
        grid=(n_blocks,),
        in_specs=[
            pl.BlockSpec((TB, D), lambda i: (i, 0)),             # x: streamed tiles
            pl.BlockSpec((D, H), lambda i: (0, 0)),              # W1: VMEM-resident
            pl.BlockSpec((1, H), lambda i: (0, 0)),              # b1: VMEM-resident
            pl.BlockSpec((1, H), lambda i: (0, 0)),              # w2 row: VMEM-resident
            pl.BlockSpec(memory_space=pltpu.MemorySpace.SMEM),   # b2: scalar in SMEM
        ],
        out_specs=pl.BlockSpec((1, TB), lambda i: (0, i)),       # lane-dense output
        compiler_params=pltpu.CompilerParams(
            dimension_semantics=("parallel",),
            vmem_limit_bytes=vmem_limit),
        cost_estimate=cost,
    )(x_c, w1_c, b1_row, w2_row, b2_s)

    # Back to the PyTorch-style [B, 1] column (cheap XLA reshape outside).
    return out_row[0].reshape(B, 1)


if __name__ == "__main__":
    # Small shapes consistent with the module's forward.
    batch = 8
    input_size = 16
    hidden_size = 32

    key = jax.random.PRNGKey(0)
    k_x, k_w1, k_b1, k_w2, k_b2 = jax.random.split(key, 5)

    x = jax.random.normal(k_x, (batch, input_size), dtype=jnp.float32)

    # Deterministic parameter init (PyTorch-style uniform(-1/sqrt(fan_in), +)).
    bound1 = 1.0 / jnp.sqrt(input_size)
    w1 = jax.random.uniform(k_w1, (input_size, hidden_size), jnp.float32, -bound1, bound1)
    b1 = jax.random.uniform(k_b1, (1, hidden_size), jnp.float32, -bound1, bound1)

    bound2 = 1.0 / jnp.sqrt(hidden_size)
    w2 = jax.random.uniform(k_w2, (hidden_size, 1), jnp.float32, -bound2, bound2)
    b2 = jax.random.uniform(k_b2, (1, 1), jnp.float32, -bound2, bound2)

    out = neural_net_forward(x, w1, b1, w2, b2)
    jax.block_until_ready(out)

    # Reference check in plain JAX (exact f32 sigmoid in the kernel now).
    ref = jax.nn.sigmoid(jnp.maximum(x @ w1 + b1, 0.0) @ w2 + b2)
    assert out.shape == (batch, 1)
    assert jnp.allclose(out, ref, atol=1e-3, rtol=1e-3)

    print("KERNEL_OK")
</pallas_src>

<mosaic_0001>
module attributes {stable_mosaic.version = 11 : i64} {
  func.func @_mlp_kernel(%arg0: i32, %arg1: memref<8x16xf32, #tpu.memory_space<vmem>>, %arg2: memref<16x32xf32, #tpu.memory_space<vmem>>, %arg3: memref<1x32xf32, #tpu.memory_space<vmem>>, %arg4: memref<1x32xf32, #tpu.memory_space<vmem>>, %arg5: memref<1xf32, #tpu.memory_space<smem>>, %arg6: memref<1x8xf32, #tpu.memory_space<vmem>>) attributes {dimension_semantics = [#tpu.dimension_semantics<parallel>], iteration_bounds = array<i64: 1>, scalar_prefetch = 0 : i64, scratch_operands = 0 : i64, tpu.core_type = #tpu.core_type<tc>, window_params = [{transform_indices = @transform_0, window_bounds = array<i64: 8, 16>}, {pipeline_mode = #tpu.pipeline_mode<synchronous>, transform_indices = @transform_1, window_bounds = array<i64: 16, 32>}, {pipeline_mode = #tpu.pipeline_mode<synchronous>, transform_indices = @transform_2, window_bounds = array<i64: 1, 32>}, {pipeline_mode = #tpu.pipeline_mode<synchronous>, transform_indices = @transform_3, window_bounds = array<i64: 1, 32>}, {transform_indices = @transform_4, window_bounds = array<i64: 1>}, {transform_indices = @transform_5, window_bounds = array<i64: 1, 8>}]} {
    %c0 = arith.constant 0 : index
    %c0_0 = arith.constant 0 : index
    %0 = vector.load %arg1[%c0, %c0_0] : memref<8x16xf32, #tpu.memory_space<vmem>>, vector<8x16xf32>
    %c0_1 = arith.constant 0 : index
    %c0_2 = arith.constant 0 : index
    %1 = vector.load %arg2[%c0_1, %c0_2] : memref<16x32xf32, #tpu.memory_space<vmem>>, vector<16x32xf32>
    %cst = arith.constant dense<0.000000e+00> : vector<8x32xf32>
    %2 = tpu.matmul %0, %1, %cst {dimension_numbers = #tpu.dot_dimension_numbers<[1], [0], [0], [1], [0, 0, 1, 1], [], []>} : vector<8x16xf32>, vector<16x32xf32>, vector<8x32xf32> -> vector<8x32xf32>
    %c0_3 = arith.constant 0 : index
    %c0_4 = arith.constant 0 : index
    %3 = vector.load %arg3[%c0_3, %c0_4] : memref<1x32xf32, #tpu.memory_space<vmem>>, vector<1x32xf32>
    %4 = vector.broadcast %3 : vector<1x32xf32> to vector<8x32xf32>
    %5 = arith.addf %2, %4 : vector<8x32xf32>
    %cst_5 = arith.constant 0.000000e+00 : f32
    %6 = vector.broadcast %cst_5 : f32 to vector<8x32xf32>
    %7 = arith.maximumf %5, %6 : vector<8x32xf32>
    %c0_6 = arith.constant 0 : index
    %c0_7 = arith.constant 0 : index
    %8 = vector.load %arg4[%c0_6, %c0_7] : memref<1x32xf32, #tpu.memory_space<vmem>>, vector<1x32xf32>
    %cst_8 = arith.constant dense<0.000000e+00> : vector<1x8xf32>
    %9 = tpu.matmul %8, %7, %cst_8 {dimension_numbers = #tpu.dot_dimension_numbers<[1], [1], [0], [0], [0, 0, 1, 0], [], []>} : vector<1x32xf32>, vector<8x32xf32>, vector<1x8xf32> -> vector<1x8xf32>
    %c0_9 = arith.constant 0 : index
    %10 = memref.load %arg5[%c0_9] : memref<1xf32, #tpu.memory_space<smem>>
    %11 = vector.broadcast %10 : f32 to vector<1x8xf32>
    %12 = arith.addf %9, %11 : vector<1x8xf32>
    %cst_10 = arith.constant 0.000000e+00 : f32
    %13 = vector.broadcast %cst_10 : f32 to vector<1x8xf32>
    %14 = arith.subf %13, %12 : vector<1x8xf32>
    %15 = math.exp %14 : vector<1x8xf32>
    %cst_11 = arith.constant 1.000000e+00 : f32
    %16 = vector.broadcast %cst_11 : f32 to vector<1x8xf32>
    %17 = arith.addf %16, %15 : vector<1x8xf32>
    %cst_12 = arith.constant 1.000000e+00 : f32
    %18 = vector.broadcast %cst_12 : f32 to vector<1x8xf32>
    %19 = arith.divf %18, %17 : vector<1x8xf32>
    %c0_13 = arith.constant 0 : index
    %c0_14 = arith.constant 0 : index
    %20 = vector.load %arg6[%c0_13, %c0_14] : memref<1x8xf32, #tpu.memory_space<vmem>>, vector<1x8xf32>
    tpu.vector_store %arg6[%c0_13, %c0_14], %19 {strides = array<i32>} : memref<1x8xf32, #tpu.memory_space<vmem>>, vector<1x8xf32>,
    return
  }
  func.func @transform_0(%arg0: i32) -> (i32, i32) {
    %c0_i32 = arith.constant 0 : i32
    %c0_i32_0 = arith.constant 0 : i32
    return %arg0, %c0_i32 : i32, i32
  }
  func.func @transform_1(%arg0: i32) -> (i32, i32) {
    %c0_i32 = arith.constant 0 : i32
    %c0_i32_0 = arith.constant 0 : i32
    %c0_i32_1 = arith.constant 0 : i32
    return %c0_i32, %c0_i32_0 : i32, i32
  }
  func.func @transform_2(%arg0: i32) -> (i32, i32) {
    %c0_i32 = arith.constant 0 : i32
    %c0_i32_0 = arith.constant 0 : i32
    %c0_i32_1 = arith.constant 0 : i32
    return %c0_i32, %c0_i32_0 : i32, i32
  }
  func.func @transform_3(%arg0: i32) -> (i32, i32) {
    %c0_i32 = arith.constant 0 : i32
    %c0_i32_0 = arith.constant 0 : i32
    %c0_i32_1 = arith.constant 0 : i32
    return %c0_i32, %c0_i32_0 : i32, i32
  }
  func.func @transform_4(%arg0: i32) -> i32 {
    %c0_i32 = arith.constant 0 : i32
    %c0_i32_0 = arith.constant 0 : i32
    return %c0_i32 : i32
  }
  func.func @transform_5(%arg0: i32) -> (i32, i32) {
    %c0_i32 = arith.constant 0 : i32
    %c0_i32_0 = arith.constant 0 : i32
    return %c0_i32, %arg0 : i32, i32
  }
}

</mosaic_0001>

<bundles_post_ra>
// kernel: tpu_custom_call.1
= control target key start
LH: loop header
LB: loop body
LE: loop exit
PB: predicated region body
PF: predicated region fallthrough
CT: control target
= control target key end

     0   :  { %11 = vsyncpa [#allocation4], 0  ;;  %s297_s0 = inlined_call_operand.hbm [shape: f32[8,16], index: 0, kind: input, shape index: {}]   ;;  %s298_s1 = inlined_call_operand.hbm [shape: f32[16,32], index: 1, kind: input, shape index: {}]   ;;  %s299_s2 = inlined_call_operand.vmem [shape: f32[1,32], index: 2, kind: input, shape index: {}]   ;;  %s300_s3 = inlined_call_operand.vmem [shape: f32[1,32], index: 3, kind: input, shape index: {}]   ;;  %s301_s4 = inlined_call_operand.<no memory space> [shape: f32[1], index: 4, kind: input, shape index: {}]   ;;  %s302_s5 = inlined_call_operand.hbm [shape: f32[1,8], index: 5, kind: output, shape index: {}]  }
   0x1   :  { %12 = vsyncpa [#allocation7], 0 }
   0x2   :  { %13 = vsyncpa [#allocation5], 0  ;;  %s19_s20 = sshll.u32 %s297_s0, 4  ;;  %s244_s21 = smov [#allocation3]   ;;  %s20_s20 = int_to_ptr.hbm [resolvable:$true] %s19_s20 }
   0x3   :  { %s21_s22 = sshll.u32 %s244_s21, 4  ;;  %s29_s25 = sshll.u32 %s298_s1, 4  ;;  %s22_s22 = int_to_ptr.vmem [resolvable:$true] %s21_s22  ;;  %s30_s25 = int_to_ptr.hbm [resolvable:$true] %s29_s25 }
   0x4   :  { %24 = dma.hbm_to_vmem [thread:$0]  %s20_s20, 128, %s22_s22, [#allocation4]  }
   0x5   :  { %s245_s26 = smov [#allocation6]   ;;  %s246_s28 = smov 128  }
   0x6   :  { %s31_s27 = sshll.u32 %s245_s26, 4  ;;  %s247_s29 = smov 8   ;;  %s32_s27 = int_to_ptr.vmem [resolvable:$true] %s31_s27 }
   0x7   :  { %37 = dma.hbm_to_vmem [thread:$0]  %s30_s25, 256, %s32_s27, [#allocation7], %s246_s28, %s246_s28, %s247_s29  }
   0x8   :  { %238 = dma.done.wait [#allocation4], 128  }
   0x9   :  { %239 = vsyncadd [#allocation4], 4294967168 }
   0xa   :  { %240 = dma.done.wait [#allocation7], 256  }
   0xb   :  { %241 = vsyncadd [#allocation7], 4294967040  ;;  %v54_v0 = vld [vmem:[#allocation6 + $0x8] sm:$0xff]  ;;  %v53_v1 = vld [vmem:[#allocation6] sm:$0xff]  ;;  %vm59_vm0 = vcmask 130048   ;;  %vm87_vm1 = vcmask 261120   ;;  %v86_v8 = vstv %s301_s4 }
   0xc   :  { %77 = vmatpush.msra.mxu0 %v54_v0  ;;  %v52_v2 = vld [vmem:[#allocation3] sm:$0xff]  ;;  %s142_s4 = sshll.u32 %s302_s5, 4  ;;  %vm133_vm5 = vcmask 57344   ;;  %s143_s4 = int_to_ptr.hbm [resolvable:$true] %s142_s4 }
   0xd   :  { %v161_v3 = vld [vmem:[%s299_s2] ss:$0 sm:$0xff]  ;;  %s248_s2 = smov [#allocation8]  }
   0xe   :  { %78 = vmatpush.msra.mxu0 %v53_v1  ;;  %v84_v7 = vld [vmem:[%s300_s3] sm:$0x1]  ;;  %s140_s3 = sshll.u32 %s248_s2, 4  ;;  %s141_s3 = int_to_ptr.vmem [resolvable:$true] %s140_s3 }
   0xf   :  { %153 = vmatmul.msk.f32.vlgmr.msra.gmra.mxu0 %vm59_vm0, %v52_v2 }
  0x8c   :  { %v80_v4 = vpop.f32.mrf.mxu0 }
  0x8d   :  { %v81_v5 = vadd.f32 %v161_v3, %v80_v4 }
  0x8f   :  { %v83_v6 = vmax.f32 %v81_v5, 0.0 }
  0x91   :  { %154 = vmatpush.xpose.msk.msra.mxu1 %vm87_vm1, %v83_v6 }
  0x94   :  { %155 = vmatmul.msk.f32.vlgmr.msra.gmra.mxu1 %vm87_vm1, %v84_v7 }
 0x111   :  { %v111_v9 = vpop.f32.mrf.mxu1 }
 0x112   :  { %v112_v10 = vadd.f32 %v111_v9, %v86_v8 }
 0x114   :  { %v114_v11 = vsub.f32 0.0, %v112_v10 }
 0x116   :  { %v115_v12 = vmul.f32 1.442695, %v114_v11 }
 0x118   :  { %162 = vpow2.f32 %v115_v12 }
 0x11e   :  { %v163_v13 = vpop.eup %162 }
 0x11f   :  { %v117_v14 = vadd.f32 1.0, %v163_v13 }
 0x121   :  { %164 = vrcp.f32 %v117_v14  ;;  %v129_v18 = vand.u32 2147483648, %v117_v14  ;;  %v127_v20 = vand.u32 2147483647, %v117_v14  ;;  %vm123_vm3 = vweird.f32 %v117_v14 }
 0x123   :  { %v130_v22 = vor.u32 1.1754944e-38, %v129_v18  ;;  %vm128_vm6 = vcmp.eq.f32.partialorder %v127_v20, 8.507059e+37 }
 0x127   :  { %v165_v15 = vpop.eup %164 }
 0x128   :  { %v119_v16 = vmul.f32 %v165_v15, %v117_v14  ;;  %vm124_vm2 = vweird.f32 %v165_v15 }
 0x129   :  { %vm125_vm4 = vmor %vm123_vm3, %vm124_vm2 }
 0x12a   :  { %v120_v17 = vsub.f32 1.0, %v119_v16 }
 0x12c   :  { %v121_v19 = vmul.f32 %v165_v15, %v120_v17 }
 0x12e   :  { %v122_v21 = vadd.f32 %v165_v15, %v121_v19 }
 0x130   :  { %v126_v23 = vsel %vm125_vm4, %v165_v15, %v122_v21 }
 0x131   :  { %v131_v24 = vsel %vm128_vm6, %v130_v22, %v126_v23 }
 0x132   :  { %134 = vst.msk [vmem:[#allocation8] sm:$0x1] %vm133_vm5, %v131_v24 }
 0x133   :  { %145 = dma.vmem_to_hbm [thread:$0]  %s141_s3, 16, %s143_s4, [#allocation5]  }
 0x134   :  { %242 = dma.done.wait [#allocation5], 16  }
 0x135   :  { %243 = vsyncadd [#allocation5], 4294967280 }
 0x136   :  { %150 = vsyncpa [#allocation4], 1 }
 0x137   :  { %151 = vsyncpa [#allocation7], 1 }
 0x138   :  { %152 = vsyncpa [#allocation5], 1 }

</bundles_post_ra>
